<compile_context>
chip_gen: v5e
topology: v5e:2x2
jax: 0.10.0
libtpu: 0.0.40
codegen_flags: <defaults>
</compile_context>

<pallas_src>
import jax
import jax.numpy as jnp
from jax.experimental import pallas as pl
from jax.experimental.pallas import tpu as pltpu


def mlp_kernel(xT_ref, params_ref, out_ref):
    # Batch-on-lanes layout:
    #   xT_ref    : (1, Bp)  input, batch on the lane axis (zero-padded cols)
    #   params_ref: (H, 4)   packed params: col0=w1, col1=b1, col2=w2, col3=b2
    #   out_ref   : (1, Bp)  prediction, batch on the lane axis
    x = xT_ref[...]                                   # (1, Bp)
    w1 = params_ref[:, 0:1]                           # (H, 1)
    b1 = params_ref[:, 1:2]                           # (H, 1)
    w2 = params_ref[:, 2:3]                           # (H, 1)
    b2 = params_ref[0:1, 3:4]                         # (1, 1)

    h = jnp.maximum(w1 * x + b1, 0.0)                 # (H, Bp)  VPU broadcast + ReLU
    y = jnp.sum(h * w2, axis=0, keepdims=True)        # (1, Bp)  XLU sublane reduce
    out_ref[...] = (y + b2).astype(out_ref.dtype)     # (1, Bp)  lane-dense store


@jax.jit
def net_forward(x, w1, b1, w2, b2):
    """Forward pass of Net.

    x : (B, F)   input (F == 1)
    w1: (H, F)   hidden.weight  (PyTorch layout)
    b1: (H,)     hidden.bias
    w2: (O, H)   predict.weight (PyTorch layout, O == 1)
    b2: (O,)     predict.bias
    returns (B, O) float32
    """
    B, F = x.shape
    H = w1.shape[0]
    O = w2.shape[0]
    assert F == 1 and O == 1, "kernel is specialized for n_feature == n_output == 1"

    # Batch on the lane axis, padded to a multiple of 128 (zero pad; padded
    # columns are sliced off after the kernel and never consumed otherwise).
    Bp = ((B + 127) // 128) * 128
    xT = jnp.zeros((1, Bp), jnp.float32).at[:, :B].set(x.T.astype(jnp.float32))

    # Pack all parameters into one (H, 4) VMEM slab -> a single param DMA.
    params = jnp.concatenate(
        [
            w1.reshape(H, 1).astype(jnp.float32),                       # col 0: w1
            b1.reshape(H, 1).astype(jnp.float32),                       # col 1: b1
            w2.T.reshape(H, 1).astype(jnp.float32),                     # col 2: w2
            jnp.broadcast_to(b2.reshape(1, 1).astype(jnp.float32), (H, 1)),  # col 3: b2
        ],
        axis=1,
    )

    out_t = pl.pallas_call(
        mlp_kernel,
        out_shape=jax.ShapeDtypeStruct((1, Bp), jnp.float32),
        in_specs=[
            pl.BlockSpec(memory_space=pltpu.MemorySpace.VMEM),   # xT     (1, Bp)
            pl.BlockSpec(memory_space=pltpu.MemorySpace.VMEM),   # params (H, 4)
        ],
        out_specs=pl.BlockSpec(memory_space=pltpu.MemorySpace.VMEM),
    )(xT, params)

    # (1, Bp) -> slice padded batch columns off, back to (B, O).
    return out_t[:, :B].T


if __name__ == "__main__":
    # batch=100, n_feature=1, n_hidden=32, n_output=1 (as implied by the script).
    B, F, H, O = 100, 1, 32, 1

    key = jax.random.PRNGKey(0)
    k1, k2, k3, k4 = jax.random.split(key, 4)

    # Deterministic synthetic parameters in PyTorch Linear layout/scale.
    w1 = jax.random.uniform(k1, (H, F), jnp.float32, -1.0, 1.0) / jnp.sqrt(F)
    b1 = jax.random.uniform(k2, (H,), jnp.float32, -1.0, 1.0) / jnp.sqrt(F)
    w2 = jax.random.uniform(k3, (O, H), jnp.float32, -1.0, 1.0) / jnp.sqrt(H)
    b2 = jax.random.uniform(k4, (O,), jnp.float32, -1.0, 1.0) / jnp.sqrt(H)

    # Input mirroring the script: 100 points in [-1, 1], shape (100, 1).
    x = jnp.linspace(-1.0, 1.0, B, dtype=jnp.float32).reshape(B, F)

    out = net_forward(x, w1, b1, w2, b2)
    out = jax.block_until_ready(out)

    # Pure-JAX reference (PyTorch semantics: x @ W.T + b).
    ref = jnp.maximum(x @ w1.T + b1, 0.0) @ w2.T + b2
    assert out.shape == (B, O)
    assert jnp.allclose(out, ref, atol=1e-5, rtol=1e-5)

    print("KERNEL_OK")
</pallas_src>

<mosaic_0001>
module attributes {stable_mosaic.version = 11 : i64} {
  func.func @mlp_kernel(%arg0: memref<1x128xf32, #tpu.memory_space<vmem>>, %arg1: memref<32x4xf32, #tpu.memory_space<vmem>>, %arg2: memref<1x128xf32, #tpu.memory_space<vmem>>) attributes {dimension_semantics = [], scalar_prefetch = 0 : i64, scratch_operands = 0 : i64, tpu.core_type = #tpu.core_type<tc>} {
    %c0 = arith.constant 0 : index
    %c0_0 = arith.constant 0 : index
    %0 = vector.load %arg0[%c0, %c0_0] : memref<1x128xf32, #tpu.memory_space<vmem>>, vector<1x128xf32>
    %c0_1 = arith.constant 0 : index
    %c0_2 = arith.constant 0 : index
    %1 = vector.load %arg1[%c0_1, %c0_2] : memref<32x4xf32, #tpu.memory_space<vmem>>, vector<32x1xf32>
    %c0_3 = arith.constant 0 : index
    %c1 = arith.constant 1 : index
    %2 = vector.load %arg1[%c0_3, %c1] : memref<32x4xf32, #tpu.memory_space<vmem>>, vector<32x1xf32>
    %c0_4 = arith.constant 0 : index
    %c2 = arith.constant 2 : index
    %3 = vector.load %arg1[%c0_4, %c2] : memref<32x4xf32, #tpu.memory_space<vmem>>, vector<32x1xf32>
    %c0_5 = arith.constant 0 : index
    %c3 = arith.constant 3 : index
    %4 = vector.load %arg1[%c0_5, %c3] : memref<32x4xf32, #tpu.memory_space<vmem>>, vector<1x1xf32>
    %5 = vector.broadcast %1 : vector<32x1xf32> to vector<32x128xf32>
    %6 = vector.broadcast %0 : vector<1x128xf32> to vector<32x128xf32>
    %7 = arith.mulf %5, %6 : vector<32x128xf32>
    %8 = vector.broadcast %2 : vector<32x1xf32> to vector<32x128xf32>
    %9 = arith.addf %7, %8 : vector<32x128xf32>
    %cst = arith.constant 0.000000e+00 : f32
    %10 = vector.broadcast %cst : f32 to vector<32x128xf32>
    %11 = arith.maximumf %9, %10 : vector<32x128xf32>
    %12 = vector.broadcast %3 : vector<32x1xf32> to vector<32x128xf32>
    %13 = arith.mulf %11, %12 : vector<32x128xf32>
    %cst_6 = arith.constant dense<0.000000e+00> : vector<128xf32>
    %14 = vector.multi_reduction <add>, %13, %cst_6 [0] : vector<32x128xf32> to vector<128xf32>
    %15 = vector.shape_cast %14 : vector<128xf32> to vector<1x128xf32>
    %16 = vector.broadcast %4 : vector<1x1xf32> to vector<1x128xf32>
    %17 = arith.addf %15, %16 : vector<1x128xf32>
    %c0_7 = arith.constant 0 : index
    %c0_8 = arith.constant 0 : index
    %18 = vector.load %arg2[%c0_7, %c0_8] : memref<1x128xf32, #tpu.memory_space<vmem>>, vector<1x128xf32>
    tpu.vector_store %arg2[%c0_7, %c0_8], %17 {strides = array<i32>} : memref<1x128xf32, #tpu.memory_space<vmem>>, vector<1x128xf32>,
    return
  }
}

</mosaic_0001>

<bundles_post_ra>
// kernel: net_forward.1
= control target key start
LH: loop header
LB: loop body
LE: loop exit
PB: predicated region body
PF: predicated region fallthrough
CT: control target
= control target key end

     0   :  { %v124_v0 = vmov 0   ;;  %v125_v4 = vmov 1   ;;  %v126_v6 = vmov 2   ;;  %v127_v8 = vmov 3   ;;  %s164_s1 = inlined_call_operand.vmem [shape: f32[32,4], index: 1, kind: input, shape index: {}]   ;;  %s165_s0 = inlined_call_operand.vmem [shape: f32[1,128], index: 0, kind: input, shape index: {}]   ;;  %s166_s2 = inlined_call_operand.vmem [shape: f32[1,128], index: 2, kind: output, shape index: {}]  }
   0x1   :  { %113 = vset.pattern.permute.xlu1 %v124_v0  ;;  %112 = vset.pattern.permute.xlu0 %v124_v0  ;;  %v14_v1 = vld [vmem:[%s164_s1 + $0x10] sm:$0xff]  ;;  %v12_v2 = vld [vmem:[%s164_s1] sm:$0xff]  ;;  %v13_v3 = vld [vmem:[%s164_s1 + $0x8] sm:$0xff] }
   0x2   :  { %29 = vperm.xlu1 %113, %v14_v1   ;;  %19 = vperm.xlu0 %112, %v12_v2   ;;  %v15_v5 = vld [vmem:[%s164_s1 + $0x18] sm:$0xff]  ;;  %v16_v7 = vld [vmem:[%s164_s1] sm:$0x1] }
   0x3   :  { %115 = vset.pattern.permute.xlu2 %v125_v4  ;;  %v123_v15 = vld [vmem:[%s165_s0] ss:$0 sm:$0xff] }
   0x4   :  { %49 = vperm.xlu2 %115, %v13_v3  }
   0xa   :  { %114 = vset.pattern.permute.xlu1 %v125_v4  ;;  %24 = vperm.xlu0 %112, %v13_v3  }
   0xb   :  { %45 = vperm.xlu1 %114, %v12_v2  }
   0xc   :  { %116 = vset.pattern.permute.xlu2 %v124_v0 }
   0xd   :  { %34 = vperm.xlu2 %116, %v15_v5  }
  0x12   :  { %117 = vset.pattern.permute.xlu0 %v125_v4 }
  0x13   :  { %57 = vperm.xlu1 %114, %v15_v5   ;;  %53 = vperm.xlu0 %117, %v14_v1  }
  0x15   :  { %118 = vset.pattern.permute.xlu2 %v126_v6 }
  0x16   :  { %69 = vperm.xlu2 %118, %v12_v2  }
  0x1b   :  { %119 = vset.pattern.permute.xlu1 %v126_v6  ;;  %120 = vset.pattern.permute.xlu0 %v126_v6 }
  0x1c   :  { %73 = vperm.xlu1 %119, %v13_v3   ;;  %81 = vperm.xlu0 %120, %v15_v5  }
  0x1e   :  { %77 = vperm.xlu2 %118, %v14_v1  }
  0x24   :  { %121 = vset.pattern.permute.xlu1 %v127_v8  ;;  %122 = vset.pattern.permute.xlu0 %v127_v8 }
  0x25   :  { %99 = vperm.xlu1 %121, %v16_v7  }
  0x5e   :  { %v50_v9 = vpop.permute.xlu2 %49 }
  0x67   :  { %v35_v12 = vpop.permute.xlu2 %34 }
  0x68   :  { %v43_v25 = vmul.f32 %v123_v15, %v35_v12 }
  0x70   :  { %v70_v16 = vpop.permute.xlu2 %69 }
  0x74   :  { %v30_v10 = vpop.permute.xlu1 %29  ;;  %v20_v11 = vpop.permute.xlu0 %19 }
  0x75   :  { %v40_v17 = vmul.f32 %v123_v15, %v20_v11  ;;  %v42_v21 = vmul.f32 %v123_v15, %v30_v10 }
  0x78   :  { %v78_v30 = vpop.permute.xlu2 %77 }
  0x7c   :  { %v25_v13 = vpop.permute.xlu0 %24 }
  0x7d   :  { %v46_v14 = vpop.permute.xlu1 %45  ;;  %v41_v18 = vmul.f32 %v123_v15, %v25_v13 }
  0x7e   :  { %v60_v22 = vadd.f32 %v46_v14, %v40_v17 }
  0x7f   :  { %v61_v23 = vadd.f32 %v50_v9, %v41_v18 }
  0x80   :  { %v64_v26 = vmax.f32 %v60_v22, 0.0 }
  0x81   :  { %v65_v29 = vmax.f32 %v61_v23, 0.0 }
  0x82   :  { %v84_v32 = vmul.f32 %v70_v16, %v64_v26 }
  0x85   :  { %v58_v19 = vpop.permute.xlu1 %57  ;;  %v54_v20 = vpop.permute.xlu0 %53 }
  0x86   :  { %v62_v24 = vadd.f32 %v54_v20, %v42_v21  ;;  %v63_v27 = vadd.f32 %v58_v19, %v43_v25 }
  0x88   :  { %v66_v28 = vmax.f32 %v62_v24, 0.0  ;;  %v67_v35 = vmax.f32 %v63_v27, 0.0 }
  0x8a   :  { %v86_v36 = vmul.f32 %v78_v30, %v66_v28 }
  0x8e   :  { %v74_v31 = vpop.permute.xlu1 %73  ;;  %v82_v34 = vpop.permute.xlu0 %81 }
  0x8f   :  { %v85_v33 = vmul.f32 %v74_v31, %v65_v29  ;;  %v87_v38 = vmul.f32 %v82_v34, %v67_v35 }
  0x91   :  { %v88_v37 = vadd.f32 %v85_v33, %v84_v32 }
  0x93   :  { %v89_v39 = vadd.f32 %v88_v37, %v86_v36 }
  0x95   :  { %v90_v40 = vadd.f32 %v89_v39, %v87_v38 }
  0x97   :  { %v91_v41 = vrot.slane %v90_v40, 4  ;;  %v100_v46 = vpop.permute.xlu1 %99 }
  0x99   :  { %v92_v42 = vadd.f32 %v91_v41, %v90_v40 }
  0x9b   :  { %v93_v43 = vrot.slane %v92_v42, 2 }
  0x9d   :  { %v94_v44 = vadd.f32 %v93_v43, %v92_v42 }
  0x9f   :  { %v95_v45 = vrot.slane %v94_v44, 1 }
  0xa1   :  { %v96_v47 = vadd.f32 %v95_v45, %v94_v44 }
  0xa3   :  { %v102_v48 = vadd.f32 %v100_v46, %v96_v47 }
  0xa5   :  { %103 = vst [vmem:[%s166_s2] sm:$0x1] %v102_v48 }

</bundles_post_ra>
